<compile_context>
chip_gen: v6e
topology: v6e:2x2x1
jax: 0.10.0
libtpu: 0.0.40
codegen_flags: <defaults>
</compile_context>

<pallas_src>
import jax
import jax.numpy as jnp
from jax.experimental import pallas as pl
from jax.experimental.pallas import tpu as pltpu


def _round_up(x, m):
    return ((x + m - 1) // m) * m


def _gen_kernel(x_ref, w1_ref, b1_ref, w2_ref, b2_ref, o_ref):
    # Linear 1: (TM, z_dim) @ (z_dim, 128) + (1, 128)  -- MXU, f32 accumulation.
    h = jnp.dot(x_ref[...], w1_ref[...], preferred_element_type=jnp.float32)
    h = h + b1_ref[...]
    # LeakyReLU(negative_slope=0.1)
    h = jnp.where(h > 0, h, 0.1 * h)
    # Linear 2: (TM, 128) @ (128, img_dim) + (1, img_dim)
    out = jnp.dot(h, w2_ref[...], preferred_element_type=jnp.float32)
    out = out + b2_ref[...]
    # Tanh on the EUP; cast only at the final store.
    o_ref[...] = jnp.tanh(out).astype(o_ref.dtype)


def _resident_spec(block_shape):
    """BlockSpec for a grid-invariant operand: single-buffered where supported."""
    idx = lambda i: (0, 0)
    try:
        return pl.BlockSpec(block_shape, idx, pipeline_mode=pl.Buffered(1))
    except TypeError:
        # Older Pallas without pipeline_mode kwarg: fall back to default buffering.
        return pl.BlockSpec(block_shape, idx)


def _default_tm():
    # Sized against default scoped-VMEM limits with single-buffered weights:
    #   v5e (16 MiB scoped): tm=1024 -> ~7 MiB
    #   v6e (32 MiB scoped): tm=2048 -> ~14 MiB
    #   v7x (32 MiB scoped, 2 TCs):  tm=4096 -> ~28 MiB
    try:
        kind = jax.devices()[0].device_kind.lower()
    except Exception:
        return 1024
    if "v5" in kind:
        return 1024
    if "v7" in kind:
        return 4096
    return 2048


def _pick_tile(B, tm):
    """Batch tile: multiple of 8 (sublane), no wrapper padding, and >= 2 grid steps
    whenever B > 8 so both v7x TensorCores get work."""
    if B <= 8:
        return 8
    half = _round_up(pl.cdiv(_round_up(B, 8), 2), 8)
    return max(8, min(tm, half))


def generator_forward(x, w1, b1, w2, b2, *, tm=None, out_dtype=jnp.float32):
    """tanh(leaky_relu(x @ w1 + b1, 0.1) @ w2 + b2).

    x: (B, z_dim) f32. Weights stored (in, out): w1 (z_dim, 128), b1 (128,),
    w2 (128, img_dim), b2 (img_dim,).
    """
    B, z_dim = x.shape
    hidden = w1.shape[1]
    img_dim = w2.shape[1]

    if tm is None:
        tm = _default_tm()
    tm_eff = _pick_tile(B, tm)

    b1_2d = b1.reshape(1, hidden)
    b2_2d = b2.reshape(1, img_dim)

    grid = (pl.cdiv(B, tm_eff),)  # partial last tile handled by Blocked edge masking

    return pl.pallas_call(
        _gen_kernel,
        out_shape=jax.ShapeDtypeStruct((B, img_dim), out_dtype),
        grid_spec=pltpu.PrefetchScalarGridSpec(
            num_scalar_prefetch=0,
            grid=grid,
            in_specs=[
                pl.BlockSpec((tm_eff, z_dim), lambda i: (i, 0)),  # x tile (double-buffered)
                _resident_spec((z_dim, hidden)),                  # w1 (resident)
                _resident_spec((1, hidden)),                      # b1 (resident)
                _resident_spec((hidden, img_dim)),                # w2 (resident)
                _resident_spec((1, img_dim)),                     # b2 (resident)
            ],
            out_specs=pl.BlockSpec((tm_eff, img_dim), lambda i: (i, 0)),
        ),
        compiler_params=pltpu.CompilerParams(
            dimension_semantics=("parallel",),
        ),
    )(x, w1, b1_2d, w2, b2_2d)


def init_params(key, z_dim, img_dim, hidden=128):
    # PyTorch nn.Linear default init: U(-1/sqrt(fan_in), 1/sqrt(fan_in)).
    k1, k2, k3, k4 = jax.random.split(key, 4)
    bound1 = 1.0 / jnp.sqrt(z_dim)
    bound2 = 1.0 / jnp.sqrt(hidden)
    # Stored as (in, out) so the kernel computes x @ W (== PyTorch x @ W.T).
    w1 = jax.random.uniform(k1, (z_dim, hidden), jnp.float32, -bound1, bound1)
    b1 = jax.random.uniform(k2, (hidden,), jnp.float32, -bound1, bound1)
    w2 = jax.random.uniform(k3, (hidden, img_dim), jnp.float32, -bound2, bound2)
    b2 = jax.random.uniform(k4, (img_dim,), jnp.float32, -bound2, bound2)
    return w1, b1, w2, b2


def reference_forward(x, w1, b1, w2, b2):
    h = x @ w1 + b1
    h = jnp.where(h > 0, h, 0.1 * h)
    return jnp.tanh(h @ w2 + b2)


if __name__ == "__main__":
    key = jax.random.PRNGKey(0)
    kx, kp = jax.random.split(key)

    z_dim = 64
    img_dim = 784  # flattened 28x28 image
    w1, b1, w2, b2 = init_params(kp, z_dim, img_dim)

    # Two cases: exact tile (batch=8) and a partial, edge-masked last tile (batch=13).
    for batch in (8, 13):
        xb = jax.random.normal(jax.random.fold_in(kx, batch), (batch, z_dim), jnp.float32)
        out = jax.block_until_ready(generator_forward(xb, w1, b1, w2, b2))
        ref = reference_forward(xb, w1, b1, w2, b2)
        assert out.shape == (batch, img_dim)
        assert jnp.allclose(out, ref, atol=1e-5, rtol=1e-5), f"mismatch vs reference (batch={batch})"

    print("KERNEL_OK")
</pallas_src>

<mosaic_0001>
module attributes {stable_mosaic.version = 11 : i64} {
  func.func @_gen_kernel(%arg0: i32, %arg1: memref<8x64xf32, #tpu.memory_space<vmem>>, %arg2: memref<64x128xf32, #tpu.memory_space<vmem>>, %arg3: memref<1x128xf32, #tpu.memory_space<vmem>>, %arg4: memref<128x784xf32, #tpu.memory_space<vmem>>, %arg5: memref<1x784xf32, #tpu.memory_space<vmem>>, %arg6: memref<8x784xf32, #tpu.memory_space<vmem>>) attributes {dimension_semantics = [#tpu.dimension_semantics<parallel>], iteration_bounds = array<i64: 1>, scalar_prefetch = 0 : i64, scratch_operands = 0 : i64, tpu.core_type = #tpu.core_type<tc>, window_params = [{transform_indices = @transform_0, window_bounds = array<i64: 8, 64>}, {pipeline_mode = #tpu.pipeline_mode<synchronous>, transform_indices = @transform_1, window_bounds = array<i64: 64, 128>}, {pipeline_mode = #tpu.pipeline_mode<synchronous>, transform_indices = @transform_2, window_bounds = array<i64: 1, 128>}, {pipeline_mode = #tpu.pipeline_mode<synchronous>, transform_indices = @transform_3, window_bounds = array<i64: 128, 784>}, {pipeline_mode = #tpu.pipeline_mode<synchronous>, transform_indices = @transform_4, window_bounds = array<i64: 1, 784>}, {transform_indices = @transform_5, window_bounds = array<i64: 8, 784>}]} {
    %c0 = arith.constant 0 : index
    %c0_0 = arith.constant 0 : index
    %0 = vector.load %arg1[%c0, %c0_0] : memref<8x64xf32, #tpu.memory_space<vmem>>, vector<8x64xf32>
    %c0_1 = arith.constant 0 : index
    %c0_2 = arith.constant 0 : index
    %1 = vector.load %arg2[%c0_1, %c0_2] : memref<64x128xf32, #tpu.memory_space<vmem>>, vector<64x128xf32>
    %cst = arith.constant dense<0.000000e+00> : vector<8x128xf32>
    %2 = tpu.matmul %0, %1, %cst {dimension_numbers = #tpu.dot_dimension_numbers<[1], [0], [0], [1], [0, 0, 1, 1], [], []>} : vector<8x64xf32>, vector<64x128xf32>, vector<8x128xf32> -> vector<8x128xf32>
    %c0_3 = arith.constant 0 : index
    %c0_4 = arith.constant 0 : index
    %3 = vector.load %arg3[%c0_3, %c0_4] : memref<1x128xf32, #tpu.memory_space<vmem>>, vector<1x128xf32>
    %4 = vector.broadcast %3 : vector<1x128xf32> to vector<8x128xf32>
    %5 = arith.addf %2, %4 : vector<8x128xf32>
    %cst_5 = arith.constant 0.000000e+00 : f32
    %6 = vector.broadcast %cst_5 : f32 to vector<8x128xf32>
    %7 = arith.cmpf ogt, %5, %6 : vector<8x128xf32>
    %cst_6 = arith.constant 1.000000e-01 : f32
    %8 = vector.broadcast %cst_6 : f32 to vector<8x128xf32>
    %9 = arith.mulf %8, %5 : vector<8x128xf32>
    %10 = arith.select %7, %5, %9 : vector<8x128xi1>, vector<8x128xf32>
    %c0_7 = arith.constant 0 : index
    %c0_8 = arith.constant 0 : index
    %11 = vector.load %arg4[%c0_7, %c0_8] : memref<128x784xf32, #tpu.memory_space<vmem>>, vector<128x784xf32>
    %cst_9 = arith.constant dense<0.000000e+00> : vector<8x784xf32>
    %12 = tpu.matmul %10, %11, %cst_9 {dimension_numbers = #tpu.dot_dimension_numbers<[1], [0], [0], [1], [0, 0, 1, 1], [], []>} : vector<8x128xf32>, vector<128x784xf32>, vector<8x784xf32> -> vector<8x784xf32>
    %c0_10 = arith.constant 0 : index
    %c0_11 = arith.constant 0 : index
    %13 = vector.load %arg5[%c0_10, %c0_11] : memref<1x784xf32, #tpu.memory_space<vmem>>, vector<1x784xf32>
    %14 = vector.broadcast %13 : vector<1x784xf32> to vector<8x784xf32>
    %15 = arith.addf %12, %14 : vector<8x784xf32>
    %16 = math.tanh %15 : vector<8x784xf32>
    %c0_12 = arith.constant 0 : index
    %c0_13 = arith.constant 0 : index
    %17 = vector.load %arg6[%c0_12, %c0_13] : memref<8x784xf32, #tpu.memory_space<vmem>>, vector<8x784xf32>
    tpu.vector_store %arg6[%c0_12, %c0_13], %16 {strides = array<i32>} : memref<8x784xf32, #tpu.memory_space<vmem>>, vector<8x784xf32>,
    return
  }
  func.func @transform_0(%arg0: i32) -> (i32, i32) {
    %c0_i32 = arith.constant 0 : i32
    %c0_i32_0 = arith.constant 0 : i32
    return %arg0, %c0_i32 : i32, i32
  }
  func.func @transform_1(%arg0: i32) -> (i32, i32) {
    %c0_i32 = arith.constant 0 : i32
    %c0_i32_0 = arith.constant 0 : i32
    %c0_i32_1 = arith.constant 0 : i32
    return %c0_i32, %c0_i32_0 : i32, i32
  }
  func.func @transform_2(%arg0: i32) -> (i32, i32) {
    %c0_i32 = arith.constant 0 : i32
    %c0_i32_0 = arith.constant 0 : i32
    %c0_i32_1 = arith.constant 0 : i32
    return %c0_i32, %c0_i32_0 : i32, i32
  }
  func.func @transform_3(%arg0: i32) -> (i32, i32) {
    %c0_i32 = arith.constant 0 : i32
    %c0_i32_0 = arith.constant 0 : i32
    %c0_i32_1 = arith.constant 0 : i32
    return %c0_i32, %c0_i32_0 : i32, i32
  }
  func.func @transform_4(%arg0: i32) -> (i32, i32) {
    %c0_i32 = arith.constant 0 : i32
    %c0_i32_0 = arith.constant 0 : i32
    %c0_i32_1 = arith.constant 0 : i32
    return %c0_i32, %c0_i32_0 : i32, i32
  }
  func.func @transform_5(%arg0: i32) -> (i32, i32) {
    %c0_i32 = arith.constant 0 : i32
    %c0_i32_0 = arith.constant 0 : i32
    return %arg0, %c0_i32 : i32, i32
  }
}

</mosaic_0001>

<bundles_post_ra>
// kernel: tpu_custom_call.1
= control target key start
LH: loop header
LB: loop body
LE: loop exit
PB: predicated region body
PF: predicated region fallthrough
CT: control target
= control target key end

     0   :  { %v696_v1 = vmov 0.0   ;;  %vm697_vm0 = vmmov 0   ;;  %vm37_vm1 = vcmask 523264   ;;  %s1138_s0 = inlined_call_operand.vmem [shape: f32[8,64], index: 0, kind: input, shape index: {}]   ;;  %s1139_s1 = inlined_call_operand.vmem [shape: f32[64,128], index: 1, kind: input, shape index: {}]   ;;  %s1140_s2 = inlined_call_operand.vmem [shape: f32[1,128], index: 2, kind: input, shape index: {}]   ;;  %s1141_s3 = inlined_call_operand.vmem [shape: f32[128,784], index: 3, kind: input, shape index: {}]   ;;  %s1142_s4 = inlined_call_operand.vmem [shape: f32[1,784], index: 4, kind: input, shape index: {}]   ;;  %s1143_s5 = inlined_call_operand.hbm [shape: f32[8,784], index: 5, kind: output, shape index: {}]  }
   0x1   :  { %v29_v0 = vld [vmem:[%s1139_s1 + $0x38] sm:$0xff]  ;;  %603 = vmatprep.subr.mxu0 %v696_v1  ;;  %v28_v2 = vld [vmem:[%s1139_s1 + $0x30] sm:$0xff]  ;;  %619 = vmatprep.mubr.msk.f32.mxu0 %vm697_vm0, %v696_v1  ;;  %v27_v3 = vld [vmem:[%s1139_s1 + $0x28] sm:$0xff] }
   0x2   :  { %604 = vmatpush3.msra.mxu0 %v29_v0  ;;  %327 = vmatprep.mubr.f32.mxu1 %v696_v1  ;;  %v220_v4 = vld [vmem:[%s1141_s3 + $0x350] sm:$0xff]  ;;  %v219_v5 = vld [vmem:[%s1141_s3 + $0x348] sm:$0xff]  ;;  %v213_v6 = vld [vmem:[%s1141_s3 + $0x318] sm:$0xff] }
   0x3   :  { %605 = vmatprep.subr.mxu0 %v696_v1  ;;  %263 = vmatprep.subr.mxu1 %v220_v4  ;;  %v26_v7 = vld [vmem:[%s1139_s1 + $0x20] sm:$0xff]  ;;  %v212_v8 = vld [vmem:[%s1141_s3 + $0x310] sm:$0xff]  ;;  %v205_v10 = vld [vmem:[%s1141_s3 + $0x2d8] sm:$0xff] }
   0x4   :  { %606 = vmatpush3.msra.mxu0 %v28_v2  ;;  %264 = vmatpush1.msra.mxu1 %v219_v5  ;;  %v206_v9 = vld [vmem:[%s1141_s3 + $0x2e0] sm:$0xff]  ;;  %v25_v11 = vld [vmem:[%s1139_s1 + $0x18] sm:$0xff]  ;;  %v199_v12 = vld [vmem:[%s1141_s3 + $0x2a8] sm:$0xff] }
   0x5   :  { %607 = vmatprep.subr.mxu0 %v696_v1  ;;  %265 = vmatprep.subr.mxu1 %v213_v6  ;;  %v198_v13 = vld [vmem:[%s1141_s3 + $0x2a0] sm:$0xff]  ;;  %v24_v14 = vld [vmem:[%s1139_s1 + $0x10] sm:$0xff]  ;;  %v191_v16 = vld [vmem:[%s1141_s3 + $0x268] sm:$0xff] }
   0x6   :  { %608 = vmatpush3.msra.mxu0 %v27_v3  ;;  %266 = vmatpush1.msra.mxu1 %v212_v8  ;;  %v192_v15 = vld [vmem:[%s1141_s3 + $0x270] sm:$0xff]  ;;  %v23_v17 = vld [vmem:[%s1139_s1 + $0x8] sm:$0xff]  ;;  %v185_v18 = vld [vmem:[%s1141_s3 + $0x238] sm:$0xff] }
   0x7   :  { %609 = vmatprep.subr.mxu0 %v696_v1  ;;  %267 = vmatprep.subr.mxu1 %v206_v9  ;;  %v184_v19 = vld [vmem:[%s1141_s3 + $0x230] sm:$0xff]  ;;  %v22_v20 = vld [vmem:[%s1139_s1] sm:$0xff]  ;;  %v221_v24 = vld [vmem:[%s1141_s3 + $0x358] sm:$0xff] }
   0x8   :  { %610 = vmatpush3.msra.mxu0 %v26_v7  ;;  %268 = vmatpush1.msra.mxu1 %v205_v10  ;;  %v178_v21 = vld [vmem:[%s1141_s3 + $0x200] sm:$0xff]  ;;  %v177_v25 = vld [vmem:[%s1141_s3 + $0x1f8] sm:$0xff]  ;;  %v215_v26 = vld [vmem:[%s1141_s3 + $0x328] sm:$0xff] }
   0x9   :  { %611 = vmatprep.subr.mxu0 %v696_v1  ;;  %269 = vmatprep.subr.mxu1 %v199_v12  ;;  %v21_v22 = vld [vmem:[%s1138_s0] sm:$0xff]  ;;  %v171_v27 = vld [vmem:[%s1141_s3 + $0x1c8] sm:$0xff]  ;;  %v208_v30 = vld [vmem:[%s1141_s3 + $0x2f0] sm:$0xff] }
   0xa   :  { %612 = vmatpush3.msra.mxu0 %v25_v11  ;;  %270 = vmatpush1.msra.mxu1 %v198_v13  ;;  %v222_v23 = vld [vmem:[%s1141_s3 + $0x360] sm:$0xff]  ;;  %v164_v31 = vld [vmem:[%s1141_s3 + $0x190] sm:$0xff]  ;;  %v207_v32 = vld [vmem:[%s1141_s3 + $0x2e8] sm:$0xff] }
   0xb   :  { %613 = vmatprep.subr.mxu0 %v696_v1  ;;  %271 = vmatprep.subr.mxu1 %v192_v15  ;;  %v214_v28 = vld [vmem:[%s1141_s3 + $0x320] sm:$0xff]  ;;  %v163_v33 = vld [vmem:[%s1141_s3 + $0x188] sm:$0xff]  ;;  %v201_v34 = vld [vmem:[%s1141_s3 + $0x2b8] sm:$0xff] }
   0xc   :  { %614 = vmatpush3.msra.mxu0 %v24_v14  ;;  %272 = vmatpush1.msra.mxu1 %v191_v16  ;;  %v170_v29 = vld [vmem:[%s1141_s3 + $0x1c0] sm:$0xff]  ;;  %v157_v35 = vld [vmem:[%s1141_s3 + $0x158] sm:$0xff]  ;;  %v200_v36 = vld [vmem:[%s1141_s3 + $0x2b0] sm:$0xff] }
   0xd   :  { %615 = vmatprep.subr.mxu0 %v696_v1  ;;  %273 = vmatprep.subr.mxu1 %v185_v18  ;;  %v156_v37 = vld [vmem:[%s1141_s3 + $0x150] sm:$0xff] }
   0xe   :  { %616 = vmatpush3.msra.mxu0 %v23_v17  ;;  %274 = vmatpush1.msra.mxu1 %v184_v19 }
   0xf   :  { %617 = vmatprep.subr.mxu0 %v696_v1  ;;  %275 = vmatprep.subr.mxu1 %v178_v21 }
  0x10   :  { %618 = vmatpush3.msra.mxu0 %v22_v20  ;;  %276 = vmatpush1.msra.mxu1 %v177_v25 }
  0x11   :  { %620 = vmatmul.mubr.msk.f32.vlgmr.msra.gmra.mxu0 %vm37_vm1, %v21_v22  ;;  %334 = vmatprep.subr.mxu0 %v222_v23 }
  0x12   :  { %335 = vmatpush1.msra.mxu0 %v221_v24  ;;  %277 = vmatprep.subr.mxu1 %v171_v27 }
  0x13   :  { %336 = vmatprep.subr.mxu0 %v215_v26  ;;  %278 = vmatpush1.msra.mxu1 %v170_v29 }
  0x14   :  { %337 = vmatpush1.msra.mxu0 %v214_v28  ;;  %279 = vmatprep.subr.mxu1 %v164_v31 }
  0x15   :  { %338 = vmatprep.subr.mxu0 %v208_v30 }
  0x16   :  { %10 = vsyncpa [#allocation3], 0  ;;  %339 = vmatpush1.msra.mxu0 %v207_v32  ;;  %v194_v38 = vld [vmem:[%s1141_s3 + $0x280] sm:$0xff]  ;;  %280 = vmatpush1.msra.mxu1 %v163_v33  ;;  %v193_v40 = vld [vmem:[%s1141_s3 + $0x278] sm:$0xff]  ;;  %vm559_vm3 = vcmask 130048  }
  0x17   :  { %v150_v39 = vld [vmem:[%s1141_s3 + $0x120] sm:$0xff]  ;;  %340 = vmatprep.subr.mxu0 %v201_v34  ;;  %281 = vmatprep.subr.mxu1 %v157_v35  ;;  %v149_v41 = vld [vmem:[%s1141_s3 + $0x118] sm:$0xff]  ;;  %v187_v42 = vld [vmem:[%s1141_s3 + $0x248] sm:$0xff] }
  0x18   :  { %341 = vmatpush1.msra.mxu0 %v200_v36  ;;  %282 = vmatpush1.msra.mxu1 %v156_v37  ;;  %v143_v43 = vld [vmem:[%s1141_s3 + $0xe8] sm:$0xff]  ;;  %v186_v44 = vld [vmem:[%s1141_s3 + $0x240] sm:$0xff]  ;;  %v180_v46 = vld [vmem:[%s1141_s3 + $0x210] sm:$0xff] }
  0x19   :  { %342 = vmatprep.subr.mxu0 %v194_v38  ;;  %283 = vmatprep.subr.mxu1 %v150_v39  ;;  %v142_v45 = vld [vmem:[%s1141_s3 + $0xe0] sm:$0xff]  ;;  %v136_v47 = vld [vmem:[%s1141_s3 + $0xb0] sm:$0xff]  ;;  %v179_v48 = vld [vmem:[%s1141_s3 + $0x208] sm:$0xff] }
  0x1a   :  { %343 = vmatpush1.msra.mxu0 %v193_v40  ;;  %284 = vmatpush1.msra.mxu1 %v149_v41  ;;  %v135_v49 = vld [vmem:[%s1141_s3 + $0xa8] sm:$0xff]  ;;  %v173_v50 = vld [vmem:[%s1141_s3 + $0x1d8] sm:$0xff]  ;;  %v172_v52 = vld [vmem:[%s1141_s3 + $0x1d0] sm:$0xff] }
  0x1b   :  { %344 = vmatprep.subr.mxu0 %v187_v42  ;;  %285 = vmatprep.subr.mxu1 %v143_v43  ;;  %v129_v51 = vld [vmem:[%s1141_s3 + $0x78] sm:$0xff]  ;;  %v166_v53 = vld [vmem:[%s1141_s3 + $0x1a0] sm:$0xff]  ;;  %v159_v55 = vld [vmem:[%s1141_s3 + $0x168] sm:$0xff] }
  0x1c   :  { %345 = vmatpush1.msra.mxu0 %v186_v44  ;;  %286 = vmatpush1.msra.mxu1 %v142_v45  ;;  %v165_v54 = vld [vmem:[%s1141_s3 + $0x198] sm:$0xff]  ;;  %v158_v56 = vld [vmem:[%s1141_s3 + $0x160] sm:$0xff]  ;;  %v152_v57 = vld [vmem:[%s1141_s3 + $0x130] sm:$0xff] }
  0x1d   :  { %346 = vmatprep.subr.mxu0 %v180_v46  ;;  %287 = vmatprep.subr.mxu1 %v136_v47  ;;  %v151_v58 = vld [vmem:[%s1141_s3 + $0x128] sm:$0xff]  ;;  %v145_v59 = vld [vmem:[%s1141_s3 + $0xf8] sm:$0xff]  ;;  %v144_v60 = vld [vmem:[%s1141_s3 + $0xf0] sm:$0xff] }
  0x1e   :  { %347 = vmatpush1.msra.mxu0 %v179_v48  ;;  %288 = vmatpush1.msra.mxu1 %v135_v49  ;;  %v138_v61 = vld [vmem:[%s1141_s3 + $0xc0] sm:$0xff]  ;;  %v137_v62 = vld [vmem:[%s1141_s3 + $0xb8] sm:$0xff]  ;;  %v131_v63 = vld [vmem:[%s1141_s3 + $0x88] sm:$0xff] }
  0x1f   :  { %348 = vmatprep.subr.mxu0 %v173_v50  ;;  %289 = vmatprep.subr.mxu1 %v129_v51  ;;  %v128_v0 = vld [vmem:[%s1141_s3 + $0x70] sm:$0xff]  ;;  %v130_v2 = vld [vmem:[%s1141_s3 + $0x80] sm:$0xff]  ;;  %v121_v5 = vld [vmem:[%s1141_s3 + $0x38] sm:$0xff] }
  0x20   :  { %349 = vmatpush1.msra.mxu0 %v172_v52  ;;  %398 = vmatprep.mubr.f32.mxu0 %v696_v1  ;;  %v122_v3 = vld [vmem:[%s1141_s3 + $0x40] sm:$0xff]  ;;  %v124_v4 = vld [vmem:[%s1141_s3 + $0x50] sm:$0xff]  ;;  %v123_v6 = vld [vmem:[%s1141_s3 + $0x48] sm:$0xff] }
  0x21   :  { %350 = vmatprep.subr.mxu0 %v166_v53  ;;  %290 = vmatpush1.msra.mxu1 %v128_v0  ;;  %v115_v7 = vld [vmem:[%s1141_s3 + $0x8] sm:$0xff]  ;;  %v117_v8 = vld [vmem:[%s1141_s3 + $0x18] sm:$0xff]  ;;  %v114_v9 = vld [vmem:[%s1141_s3] sm:$0xff] }
  0x22   :  { %351 = vmatpush1.msra.mxu0 %v165_v54  ;;  %291 = vmatprep.subr.mxu1 %v122_v3  ;;  %v116_v10 = vld [vmem:[%s1141_s3 + $0x10] sm:$0xff]  ;;  %v575_v12 = vld [vmem:[%s1140_s2] ss:$0 sm:$0xff]  ;;  %v223_v17 = vld [vmem:[%s1141_s3 + $0x368] sm:$0xff] }
  0x23   :  { %352 = vmatprep.subr.mxu0 %v159_v55  ;;  %292 = vmatpush1.msra.mxu1 %v121_v5  ;;  %v224_v11 = vld [vmem:[%s1141_s3 + $0x370] sm:$0xff]  ;;  %v225_v18 = vld [vmem:[%s1141_s3 + $0x378] sm:$0xff]  ;;  %v218_v22 = vld [vmem:[%s1141_s3 + $0x340] sm:$0xff] }
  0x24   :  { %353 = vmatpush1.msra.mxu0 %v158_v56  ;;  %293 = vmatprep.subr.mxu1 %v115_v7  ;;  %v217_v20 = vld [vmem:[%s1141_s3 + $0x338] sm:$0xff]  ;;  %v216_v21 = vld [vmem:[%s1141_s3 + $0x330] sm:$0xff]  ;;  %v210_v23 = vld [vmem:[%s1141_s3 + $0x300] sm:$0xff] }
  0x25   :  { %354 = vmatprep.subr.mxu0 %v152_v57  ;;  %294 = vmatpush1.msra.mxu1 %v114_v9  ;;  %v209_v24 = vld [vmem:[%s1141_s3 + $0x2f8] sm:$0xff]  ;;  %v211_v25 = vld [vmem:[%s1141_s3 + $0x308] sm:$0xff]  ;;  %v202_v27 = vld [vmem:[%s1141_s3 + $0x2c0] sm:$0xff] }
  0x26   :  { %355 = vmatpush1.msra.mxu0 %v151_v58  ;;  %405 = vmatprep.subr.mxu1 %v224_v11  ;;  %v203_v26 = vld [vmem:[%s1141_s3 + $0x2c8] sm:$0xff]  ;;  %v204_v28 = vld [vmem:[%s1141_s3 + $0x2d0] sm:$0xff]  ;;  %v197_v31 = vld [vmem:[%s1141_s3 + $0x298] sm:$0xff] }
  0x27   :  { %356 = vmatprep.subr.mxu0 %v145_v59  ;;  %v196_v29 = vld [vmem:[%s1141_s3 + $0x290] sm:$0xff]  ;;  %v195_v30 = vld [vmem:[%s1141_s3 + $0x288] sm:$0xff]  ;;  %v189_v32 = vld [vmem:[%s1141_s3 + $0x258] sm:$0xff] }
  0x28   :  { %357 = vmatpush1.msra.mxu0 %v144_v60  ;;  %v188_v33 = vld [vmem:[%s1141_s3 + $0x250] sm:$0xff]  ;;  %v190_v34 = vld [vmem:[%s1141_s3 + $0x260] sm:$0xff]  ;;  %v181_v36 = vld [vmem:[%s1141_s3 + $0x218] sm:$0xff] }
  0x29   :  { %358 = vmatprep.subr.mxu0 %v138_v61  ;;  %v182_v35 = vld [vmem:[%s1141_s3 + $0x220] sm:$0xff]  ;;  %v183_v37 = vld [vmem:[%s1141_s3 + $0x228] sm:$0xff]  ;;  %v176_v40 = vld [vmem:[%s1141_s3 + $0x1f0] sm:$0xff] }
  0x2a   :  { %359 = vmatpush1.msra.mxu0 %v137_v62  ;;  %v175_v38 = vld [vmem:[%s1141_s3 + $0x1e8] sm:$0xff]  ;;  %v174_v39 = vld [vmem:[%s1141_s3 + $0x1e0] sm:$0xff]  ;;  %v168_v41 = vld [vmem:[%s1141_s3 + $0x1b0] sm:$0xff] }
  0x2b   :  { %360 = vmatprep.subr.mxu0 %v131_v63  ;;  %v167_v42 = vld [vmem:[%s1141_s3 + $0x1a8] sm:$0xff]  ;;  %v169_v43 = vld [vmem:[%s1141_s3 + $0x1b8] sm:$0xff]  ;;  %v160_v45 = vld [vmem:[%s1141_s3 + $0x170] sm:$0xff] }
  0x2c   :  { %361 = vmatpush1.msra.mxu0 %v130_v2  ;;  %v161_v44 = vld [vmem:[%s1141_s3 + $0x178] sm:$0xff]  ;;  %v162_v46 = vld [vmem:[%s1141_s3 + $0x180] sm:$0xff]  ;;  %v155_v49 = vld [vmem:[%s1141_s3 + $0x148] sm:$0xff]  ;;  %v228_v2 = vlaneseq }
  0x2d   :  { %362 = vmatprep.subr.mxu0 %v124_v4  ;;  %v154_v47 = vld [vmem:[%s1141_s3 + $0x140] sm:$0xff]  ;;  %v153_v48 = vld [vmem:[%s1141_s3 + $0x138] sm:$0xff]  ;;  %v147_v50 = vld [vmem:[%s1141_s3 + $0x108] sm:$0xff] }
  0x2e   :  { %363 = vmatpush1.msra.mxu0 %v123_v6  ;;  %v146_v51 = vld [vmem:[%s1141_s3 + $0x100] sm:$0xff]  ;;  %v148_v52 = vld [vmem:[%s1141_s3 + $0x110] sm:$0xff]  ;;  %v139_v54 = vld [vmem:[%s1141_s3 + $0xc8] sm:$0xff]  ;;  %v229_v3 = vshrl.u32 %v228_v2, 7 }
  0x2f   :  { %364 = vmatprep.subr.mxu0 %v117_v8  ;;  %v140_v53 = vld [vmem:[%s1141_s3 + $0xd0] sm:$0xff]  ;;  %v141_v55 = vld [vmem:[%s1141_s3 + $0xd8] sm:$0xff]  ;;  %v134_v58 = vld [vmem:[%s1141_s3 + $0xa0] sm:$0xff] }
  0x30   :  { %365 = vmatpush1.msra.mxu0 %v116_v10  ;;  %v133_v56 = vld [vmem:[%s1141_s3 + $0x98] sm:$0xff]  ;;  %v132_v57 = vld [vmem:[%s1141_s3 + $0x90] sm:$0xff]  ;;  %v126_v59 = vld [vmem:[%s1141_s3 + $0x60] sm:$0xff]  ;;  %v230_v4 = vsub.s32 0, %v229_v3  ;;  %v238_v5 = vsub.s32 2, %v229_v3  ;;  %v234_v7 = vsub.s32 1, %v229_v3 }
  0x31   :  { %622 = vmatprep.subr.mxu0 %v696_v1  ;;  %v125_v60 = vld [vmem:[%s1141_s3 + $0x58] sm:$0xff]  ;;  %v127_v61 = vld [vmem:[%s1141_s3 + $0x68] sm:$0xff]  ;;  %v118_v63 = vld [vmem:[%s1141_s3 + $0x20] sm:$0xff]  ;;  %v242_v8 = vsub.s32 3, %v229_v3 }
  0x32   :  { %v119_v62 = vld [vmem:[%s1141_s3 + $0x28] sm:$0xff]  ;;  %v120_v0 = vld [vmem:[%s1141_s3 + $0x30] sm:$0xff]  ;;  %v226_v6 = vld [vmem:[%s1142_s4] sm:$0x7f]  ;;  %s698_s4 = smov [#allocation2]  }
  0x33   :  { %v231_v9 = vrot.slane %v226_v6, %v230_v4  ;;  %v239_v10 = vrot.slane %v226_v6, %v238_v5  ;;  %v235_v11 = vrot.slane %v226_v6, %v234_v7  ;;  %s567_s18 = sshll.u32 %s698_s4, 4  ;;  %s568_s18 = int_to_ptr.vmem [resolvable:$true] %s567_s18 }
  0x34   :  { %s674_s19 = scalar_lea.vmem %s568_s18, 896  ;;  %p679_p1 = scmp.lt.s32.totalorder %s568_s18, %s568_s18 }
  0x35   :  { %p675_p0 = scmp.ne.s32.totalorder %s568_s18, %s674_s19  ;;  %p680_p2 = scmp.lt.s32.totalorder %s674_s19, %s674_s19 }
  0x37   :  { %p681_p3 = por %p680_p2, %p679_p1 }
  0x39   :  { %p682_p4 = pnand %p681_p3, %p675_p0 }
  0xd1   :  { %v107_v13 = vpop.f32.mrf.mxu0 }
  0xd2   :  { %v108_v14 = vadd.f32 %v575_v12, %v107_v13  ;;  %v243_v12 = vrot.slane %v226_v6, %v242_v8 }
  0xd3   :  { %v621_v15 = vpop.f32.mrf.mxu0 }
  0xd4   :  { %vm111_vm2 = vcmp.gt.f32.partialorder %v108_v14, 0.0  ;;  %v112_v16 = vmul.f32 0.1, %v108_v14 }
  0xd6   :  { %v973_v19 = vsel %vm111_vm2, %v108_v14, %v112_v16 }
  0xd7   :  { %328 = vmatmul.mubr.f32.vlgmr.msra.gmra.mxu1 %v973_v19  ;;  %399 = vmatmul.mubr.f32.vlgmr.msra.gmra.mxu0 %v973_v19 }
  0xd8   :  { %406 = vmatpush1.msra.mxu1 %v223_v17  ;;  %623 = vmatpush3.msra.mxu0 %v225_v18 }
  0xd9   :  { %407 = vmatprep.subr.mxu1 %v217_v20  ;;  %624 = vmatprep.subr.mxu0 %v696_v1 }
  0xda   :  { %408 = vmatpush1.msra.mxu1 %v216_v21  ;;  %625 = vmatpush3.msra.mxu0 %v218_v22 }
  0xdb   :  { %409 = vmatprep.subr.mxu1 %v210_v23  ;;  %626 = vmatprep.subr.mxu0 %v696_v1 }
  0xdc   :  { %410 = vmatpush1.msra.mxu1 %v209_v24  ;;  %627 = vmatpush3.msra.mxu0 %v211_v25  ;;  %v246_v24 = vsub.s32 4, %v229_v3  ;;  %v254_v25 = vsub.s32 6, %v229_v3 }
  0xdd   :  { %411 = vmatprep.subr.mxu1 %v203_v26  ;;  %628 = vmatprep.subr.mxu0 %v696_v1  ;;  %v250_v26 = vsub.s32 5, %v229_v3 }
  0xde   :  { %412 = vmatpush1.msra.mxu1 %v202_v27  ;;  %629 = vmatpush3.msra.mxu0 %v204_v28  ;;  %v247_v27 = vrot.slane %v226_v6, %v246_v24  ;;  %v255_v28 = vrot.slane %v226_v6, %v254_v25 }
  0xdf   :  { %413 = vmatprep.subr.mxu1 %v196_v29  ;;  %630 = vmatprep.subr.mxu0 %v696_v1  ;;  %v251_v29 = vrot.slane %v226_v6, %v250_v26 }
  0xe0   :  { %414 = vmatpush1.msra.mxu1 %v195_v30  ;;  %631 = vmatpush3.msra.mxu0 %v197_v31 }
  0xe1   :  { %415 = vmatprep.subr.mxu1 %v189_v32  ;;  %632 = vmatprep.subr.mxu0 %v696_v1 }
  0xe2   :  { %416 = vmatpush1.msra.mxu1 %v188_v33  ;;  %633 = vmatpush3.msra.mxu0 %v190_v34 }
  0xe3   :  { %417 = vmatprep.subr.mxu1 %v182_v35  ;;  %634 = vmatprep.subr.mxu0 %v696_v1 }
  0xe4   :  { %418 = vmatpush1.msra.mxu1 %v181_v36  ;;  %635 = vmatpush3.msra.mxu0 %v183_v37 }
  0xe5   :  { %419 = vmatprep.subr.mxu1 %v175_v38  ;;  %636 = vmatprep.subr.mxu0 %v696_v1 }
  0xe6   :  { %420 = vmatpush1.msra.mxu1 %v174_v39  ;;  %637 = vmatpush3.msra.mxu0 %v176_v40 }
  0xe7   :  { %421 = vmatprep.subr.mxu1 %v168_v41  ;;  %638 = vmatprep.subr.mxu0 %v696_v1 }
  0xe8   :  { %422 = vmatpush1.msra.mxu1 %v167_v42  ;;  %639 = vmatpush3.msra.mxu0 %v169_v43 }
  0xe9   :  { %423 = vmatprep.subr.mxu1 %v161_v44  ;;  %640 = vmatprep.subr.mxu0 %v696_v1 }
  0xea   :  { %424 = vmatpush1.msra.mxu1 %v160_v45  ;;  %641 = vmatpush3.msra.mxu0 %v162_v46 }
  0xeb   :  { %425 = vmatprep.subr.mxu1 %v154_v47  ;;  %642 = vmatprep.subr.mxu0 %v696_v1 }
  0xec   :  { %426 = vmatpush1.msra.mxu1 %v153_v48  ;;  %643 = vmatpush3.msra.mxu0 %v155_v49 }
  0xed   :  { %427 = vmatprep.subr.mxu1 %v147_v50  ;;  %644 = vmatprep.subr.mxu0 %v696_v1 }
  0xee   :  { %428 = vmatpush1.msra.mxu1 %v146_v51  ;;  %645 = vmatpush3.msra.mxu0 %v148_v52 }
  0xef   :  { %429 = vmatprep.subr.mxu1 %v140_v53  ;;  %646 = vmatprep.subr.mxu0 %v696_v1 }
  0xf0   :  { %430 = vmatpush1.msra.mxu1 %v139_v54  ;;  %647 = vmatpush3.msra.mxu0 %v141_v55 }
  0xf1   :  { %431 = vmatprep.subr.mxu1 %v133_v56  ;;  %648 = vmatprep.subr.mxu0 %v696_v1 }
  0xf2   :  { %432 = vmatpush1.msra.mxu1 %v132_v57  ;;  %649 = vmatpush3.msra.mxu0 %v134_v58 }
  0xf3   :  { %433 = vmatprep.subr.mxu1 %v126_v59  ;;  %650 = vmatprep.subr.mxu0 %v696_v1 }
  0xf4   :  { %434 = vmatpush1.msra.mxu1 %v125_v60  ;;  %651 = vmatpush3.msra.mxu0 %v127_v61 }
  0xf5   :  { %435 = vmatprep.subr.mxu1 %v119_v62  ;;  %652 = vmatprep.subr.mxu0 %v696_v1 }
  0xf6   :  { %436 = vmatpush1.msra.mxu1 %v118_v63  ;;  %469 = vmatprep.mubr.f32.mxu1 %v696_v1 }
  0xf7   :  { %653 = vmatpush3.msra.mxu0 %v120_v0  ;;  %654 = vmatprep.mubr.msk.f32.mxu0 %vm697_vm0, %v696_v1 }
  0xf8   :  { %470 = vmatmul.mubr.f32.vlgmr.msra.gmra.mxu1 %v973_v19  ;;  %655 = vmatmul.mubr.f32.vlgmr.msra.gmra.mxu0 %v973_v19 }
 0x197   :  { %v329_v13 = vpop.f32.mrf.mxu1  ;;  %v400_v1 = vpop.f32.mrf.mxu0 }
 0x198   :  { %v330_v14 = vadd.f32 %v329_v13, %v231_v9  ;;  %v401_v15 = vadd.f32 %v400_v1, %v239_v10 }
 0x199   :  { %v331_v16 = vpop.f32.mrf.mxu1  ;;  %v402_v17 = vpop.f32.mrf.mxu0 }
 0x19a   :  { %660 = vtanh.f32 %v330_v14  ;;  %v332_v18 = vadd.f32 %v331_v16, %v235_v11  ;;  %v403_v19 = vadd.f32 %v402_v17, %v243_v12 }
 0x19b   :  { %662 = vtanh.f32 %v401_v15 }
 0x19c   :  { %664 = vtanh.f32 %v332_v18 }
 0x19d   :  { %666 = vtanh.f32 %v403_v19 }
 0x1a7   :  { %v661_v20 = vpop.eup %660 }
 0x1a8   :  { %v663_v21 = vpop.eup %662  ;;  %553 = vst [vmem:[#allocation2] sm:$0xff] %v661_v20 }
 0x1a9   :  { %v665_v22 = vpop.eup %664  ;;  %555 = vst [vmem:[#allocation2 + $0x10] sm:$0xff] %v663_v21 }
 0x1aa   :  { %v667_v23 = vpop.eup %666  ;;  %554 = vst [vmem:[#allocation2 + $0x8] sm:$0xff] %v665_v22 }
 0x1ab   :  { %556 = vst [vmem:[#allocation2 + $0x18] sm:$0xff] %v667_v23 }
 0x1b8   :  { %v471_v30 = vpop.f32.mrf.mxu1  ;;  %v542_v31 = vpop.f32.mrf.mxu0 }
 0x1b9   :  { %v472_v32 = vadd.f32 %v471_v30, %v247_v27  ;;  %v543_v33 = vadd.f32 %v542_v31, %v255_v28 }
 0x1ba   :  { %v473_v34 = vpop.f32.mrf.mxu1  ;;  %v656_v35 = vpop.f32.mrf.mxu0 }
 0x1bb   :  { %668 = vtanh.f32 %v472_v32  ;;  %v474_v36 = vadd.f32 %v473_v34, %v251_v29 }
 0x1bc   :  { %670 = vtanh.f32 %v543_v33 }
 0x1bd   :  { %672 = vtanh.f32 %v474_v36 }
 0x1c8   :  { %v669_v37 = vpop.eup %668 }
 0x1c9   :  { %v671_v38 = vpop.eup %670  ;;  %557 = vst [vmem:[#allocation2 + $0x20] sm:$0xff] %v669_v37 }
 0x1ca   :  { %v673_v39 = vpop.eup %672  ;;  %560 = vst.msk [vmem:[#allocation2 + $0x30] sm:$0xff] %vm559_vm3, %v671_v38 }
 0x1cb   :  { %558 = vst [vmem:[#allocation2 + $0x28] sm:$0xff] %v673_v39 }
 0x1cc   :  { %685 = shalt.err (!%p682_p4)
}
 0x1cd   :  { %570 = dma.vmem_to_hbm [thread:$0]  %s568_s18, 896, %s1143_s5, [#allocation3]  }
 0x1ce   :  { %694 = dma.done.wait [#allocation3], 896  }
 0x1cf   :  { %695 = vsyncadd [#allocation3], 4294966400 }
 0x1d0   :  { %574 = vsyncpa [#allocation3], 1 }

</bundles_post_ra>
